<compile_context>
chip_gen: v5e
topology: v5e:2x2
jax: 0.10.0
libtpu: 0.0.40
codegen_flags: <defaults>
</compile_context>

<pallas_src>
import functools

import jax
import jax.numpy as jnp
from jax import lax
from jax.experimental import pallas as pl
from jax.experimental.pallas import tpu as pltpu


def _filter_enhance_kernel(x_ref, w_ref, o_ref, *, n_valid, n_pad, k,
                           left_pad, right_pad, mac_dtype):
    """One grid step: (bt, n_pad) signal rows -> (bt, F_out, n_pad) 'same' conv outputs."""
    x = x_ref[...]                                     # (bt, n_pad)
    eps = jnp.finfo(x.dtype).eps

    # Per-row max over the *valid* samples only (padded lanes excluded when N was padded).
    if n_valid < n_pad:
        col = lax.broadcasted_iota(jnp.int32, x.shape, 1)
        x_for_max = jnp.where(col < n_valid, x, -jnp.inf)
    else:
        x_for_max = x
    m = jnp.max(x_for_max, axis=-1, keepdims=True)     # (bt, 1)
    xn = (x / jnp.maximum(m, eps)).astype(mac_dtype)   # normalization hoisted: done once

    bt = x.shape[0]
    # Fused 'same' padding: concatenate zeros along the lane dim inside VMEM.
    pieces = []
    if left_pad > 0:
        pieces.append(jnp.zeros((bt, left_pad), xn.dtype))
    pieces.append(xn)
    if right_pad > 0:
        pieces.append(jnp.zeros((bt, right_pad), xn.dtype))
    xp = jnp.concatenate(pieces, axis=-1) if len(pieces) > 1 else xn   # (bt, n_pad + K - 1)

    w = w_ref[...].astype(mac_dtype)                   # (F_out, K)

    # Cross-correlation: out[b, f, t] = sum_k w[f, k] * xn_padded[b, t + k]
    # Tap 0 initializes the f32 accumulator (saves one full (bt, F_out, n_pad) add pass).
    acc = (xp[:, 0:n_pad][:, None, :] * w[:, 0:1][None, :, :]).astype(jnp.float32)
    for tap in range(1, k):                            # K is small & static -> full unroll
        xs = xp[:, tap:tap + n_pad]                    # (bt, n_pad) shifted normalized rows
        wt = w[:, tap:tap + 1]                         # (F_out, 1)
        acc = acc + xs[:, None, :] * wt[None, :, :]    # promotes to f32 against acc
    o_ref[...] = acc.astype(o_ref.dtype)


def _tpu_caps():
    """(vmem_capacity_bytes, tensorcores_per_chip) with conservative fallbacks."""
    vmem_cap = 64 * 1024 * 1024                        # conservative default (v7x per-TC)
    try:
        info = pltpu.get_tpu_info()
        vmem_cap = int(getattr(info, "vmem_capacity_bytes", vmem_cap))
    except Exception:
        pass
    num_cores = 1
    try:
        kind = jax.devices()[0].device_kind.lower()
        # v4 / v5p megacore and v7x have 2 TensorCores per chip; v5e / v6e have 1.
        if any(tag in kind for tag in ("v4", "v5p", "v7", "7x")):
            num_cores = 2
    except Exception:
        pass
    return vmem_cap, num_cores


def _pick_block_rows(B, n_pad, F_out, K, vmem_cap, num_cores):
    """Biggest batch-row block that fits the per-step VMEM budget; split only for multi-TC."""
    # Per-step budget ~3/8 of physical VMEM (leaves double-buffer + compiler headroom):
    # ~48 MiB on v5e/v6e (128 MiB), ~24 MiB on v7x (64 MiB per TC).
    step_budget = max(4 * 1024 * 1024, (vmem_cap * 3) // 8)
    # Resident f32 bytes per batch row: double-buffered input (2*N) + padded copy (~N)
    # + K materialized tap slices (K*N) + f32 accumulator (F_out*N)
    # + double-buffered output block (2*F_out*N).
    bytes_per_row = 4 * n_pad * (3 * F_out + K + 4)
    cap = max(1, step_budget // bytes_per_row)
    if num_cores > 1 and B > 1:
        # Only multi-TensorCore chips benefit from >=num_cores grid steps.
        cap = min(cap, -(-B // num_cores))
    bt = max(1, min(B, cap))
    if bt >= 8 and bt < B:
        bt = (bt // 8) * 8                             # sublane-dense input / norm path
    return bt


def filter_enhance(X, filters, mac_dtype=None):
    """X: (B, 1, N); filters: (FB, FH, 1, K) -> (B, FB*FH, N)."""
    B, C, N = X.shape
    assert C == 1, "conv1d with (F_out, 1, K) weights and groups=1 needs in_channels == 1"
    FB, FH, Cf, K = filters.shape
    assert Cf == 1
    F_out = FB * FH
    if mac_dtype is None:
        mac_dtype = X.dtype                            # pass jnp.bfloat16 on v6e/v7x if OK

    # PyTorch padding='same': total = K-1, left = total//2, extra goes to the right.
    total_pad = K - 1
    left_pad = total_pad // 2
    right_pad = total_pad - left_pad

    x_rows = X[:, 0, :]                                # (B, N), free squeeze
    w = filters.reshape(F_out, K)                      # 'b h c n -> (b h) n'

    # Lane-dense stores: pad signal length to a multiple of 128 (zero pad on the right;
    # the in-kernel max masks the pad so normalization is unchanged; trailing zeros behave
    # exactly like the conv's own zero 'same' padding for the first N outputs).
    n_pad = -(-N // 128) * 128
    if n_pad != N:
        x_rows = jnp.pad(x_rows, ((0, 0), (0, n_pad - N)))

    vmem_cap, num_cores = _tpu_caps()
    bt = _pick_block_rows(B, n_pad, F_out, K, vmem_cap, num_cores)
    grid = -(-B // bt)                                 # partial last block handled by masking
    vmem_limit = max(32 * 1024 * 1024, (vmem_cap * 3) // 4)

    kernel = functools.partial(
        _filter_enhance_kernel, n_valid=N, n_pad=n_pad, k=K,
        left_pad=left_pad, right_pad=right_pad, mac_dtype=mac_dtype)

    itemsize = jnp.dtype(X.dtype).itemsize
    cost = pl.CostEstimate(
        flops=2 * B * F_out * n_pad * K + 2 * B * n_pad,
        transcendentals=0,
        bytes_accessed=itemsize * (B * n_pad + F_out * K + B * F_out * n_pad))

    out = pl.pallas_call(
        kernel,
        out_shape=jax.ShapeDtypeStruct((B, F_out, n_pad), X.dtype),
        grid_spec=pltpu.PrefetchScalarGridSpec(
            num_scalar_prefetch=0,
            grid=(grid,),
            in_specs=[
                pl.BlockSpec((bt, n_pad), lambda i: (i, 0)),     # bt raw signal rows
                pl.BlockSpec((F_out, K), lambda i: (0, 0)),      # all filters (tiny, resident)
            ],
            out_specs=pl.BlockSpec((bt, F_out, n_pad), lambda i: (i, 0, 0)),
        ),
        compiler_params=pltpu.CompilerParams(
            dimension_semantics=("parallel",),
            vmem_limit_bytes=int(vmem_limit),
        ),
        cost_estimate=cost,
    )(x_rows, w)

    if n_pad != N:
        out = out[..., :N]
    # TODO(synk): PyTorch mutates X in place (X /= ...); only the conv output is returned here.
    return out


def filter_enhance_ref(X, filters):
    """Pure-JAX reference matching the PyTorch forward."""
    eps = jnp.finfo(X.dtype).eps
    Xn = X / jnp.maximum(jnp.max(X, axis=-1, keepdims=True), eps)
    FB, FH, _, K = filters.shape
    W = filters.reshape(FB * FH, 1, K)
    left = (K - 1) // 2
    right = (K - 1) - left
    return lax.conv_general_dilated(
        Xn, W, window_strides=(1,), padding=[(left, right)],
        dimension_numbers=("NCH", "OIH", "NCH"))


if __name__ == "__main__":
    key = jax.random.PRNGKey(0)
    k1, k2 = jax.random.split(key)

    # Small shapes implied by the forward: X (batch, 1 channel, length),
    # filters (filter-batch, heads, 1, kernel_size).
    B, C, N = 2, 1, 128
    FB, FH, K = 2, 3, 7

    X = jax.random.normal(k1, (B, C, N), dtype=jnp.float32)
    filters = jax.random.normal(k2, (FB, FH, 1, K), dtype=jnp.float32)

    out = jax.block_until_ready(filter_enhance(X, filters))
    ref = filter_enhance_ref(X, filters)

    assert out.shape == (B, FB * FH, N), out.shape
    max_err = float(jnp.max(jnp.abs(out - ref)))
    assert max_err < 1e-4, f"mismatch vs reference: {max_err}"
    print("KERNEL_OK")
</pallas_src>

<mosaic_0001>
module attributes {stable_mosaic.version = 11 : i64} {
  func.func @_filter_enhance_kernel(%arg0: i32, %arg1: memref<2x128xf32, #tpu.memory_space<vmem>>, %arg2: memref<6x7xf32, #tpu.memory_space<vmem>>, %arg3: memref<2x6x128xf32, #tpu.memory_space<vmem>>) attributes {dimension_semantics = [#tpu.dimension_semantics<parallel>], iteration_bounds = array<i64: 1>, scalar_prefetch = 0 : i64, scratch_operands = 0 : i64, tpu.core_type = #tpu.core_type<tc>, window_params = [{transform_indices = @transform_0, window_bounds = array<i64: 2, 128>}, {pipeline_mode = #tpu.pipeline_mode<synchronous>, transform_indices = @transform_1, window_bounds = array<i64: 6, 7>}, {transform_indices = @transform_2, window_bounds = array<i64: 2, 6, 128>}]} {
    %c0 = arith.constant 0 : index
    %c0_0 = arith.constant 0 : index
    %0 = vector.load %arg1[%c0, %c0_0] : memref<2x128xf32, #tpu.memory_space<vmem>>, vector<2x128xf32>
    %cst = arith.constant dense<0xFF800000> : vector<2xf32>
    %1 = vector.multi_reduction <maximumf>, %0, %cst [1] : vector<2x128xf32> to vector<2xf32>
    %2 = vector.shape_cast %1 : vector<2xf32> to vector<2x1xf32>
    %cst_1 = arith.constant 1.1920929E-7 : f32
    %3 = vector.broadcast %cst_1 : f32 to vector<2x1xf32>
    %4 = arith.maximumf %2, %3 : vector<2x1xf32>
    %5 = vector.broadcast %4 : vector<2x1xf32> to vector<2x128xf32>
    %6 = arith.divf %0, %5 : vector<2x128xf32>
    %cst_2 = arith.constant 0.000000e+00 : f32
    %7 = vector.broadcast %cst_2 : f32 to vector<2x3xf32>
    %cst_3 = arith.constant 0.000000e+00 : f32
    %8 = vector.broadcast %cst_3 : f32 to vector<2x3xf32>
    %9 = tpu.concatenate %7, %6, %8 in 1 : vector<2x3xf32>, vector<2x128xf32>, vector<2x3xf32> -> vector<2x134xf32>
    %c0_4 = arith.constant 0 : index
    %c0_5 = arith.constant 0 : index
    %10 = vector.load %arg2[%c0_4, %c0_5] : memref<6x7xf32, #tpu.memory_space<vmem>>, vector<6x7xf32>
    %11 = vector.extract_strided_slice %9 {offsets = [0, 0], sizes = [2, 128], strides = [1, 1]} : vector<2x134xf32> to vector<2x128xf32>
    %12 = vector.shape_cast %11 : vector<2x128xf32> to vector<2x1x128xf32>
    %13 = vector.extract_strided_slice %10 {offsets = [0, 0], sizes = [6, 1], strides = [1, 1]} : vector<6x7xf32> to vector<6x1xf32>
    %14 = vector.shape_cast %13 : vector<6x1xf32> to vector<1x6x1xf32>
    %15 = vector.broadcast %12 : vector<2x1x128xf32> to vector<2x6x128xf32>
    %16 = vector.broadcast %14 : vector<1x6x1xf32> to vector<2x6x128xf32>
    %17 = arith.mulf %15, %16 : vector<2x6x128xf32>
    %18 = vector.extract_strided_slice %9 {offsets = [0, 1], sizes = [2, 128], strides = [1, 1]} : vector<2x134xf32> to vector<2x128xf32>
    %19 = vector.extract_strided_slice %10 {offsets = [0, 1], sizes = [6, 1], strides = [1, 1]} : vector<6x7xf32> to vector<6x1xf32>
    %20 = vector.shape_cast %18 : vector<2x128xf32> to vector<2x1x128xf32>
    %21 = vector.shape_cast %19 : vector<6x1xf32> to vector<1x6x1xf32>
    %22 = vector.broadcast %20 : vector<2x1x128xf32> to vector<2x6x128xf32>
    %23 = vector.broadcast %21 : vector<1x6x1xf32> to vector<2x6x128xf32>
    %24 = arith.mulf %22, %23 : vector<2x6x128xf32>
    %25 = arith.addf %17, %24 : vector<2x6x128xf32>
    %26 = vector.extract_strided_slice %9 {offsets = [0, 2], sizes = [2, 128], strides = [1, 1]} : vector<2x134xf32> to vector<2x128xf32>
    %27 = vector.extract_strided_slice %10 {offsets = [0, 2], sizes = [6, 1], strides = [1, 1]} : vector<6x7xf32> to vector<6x1xf32>
    %28 = vector.shape_cast %26 : vector<2x128xf32> to vector<2x1x128xf32>
    %29 = vector.shape_cast %27 : vector<6x1xf32> to vector<1x6x1xf32>
    %30 = vector.broadcast %28 : vector<2x1x128xf32> to vector<2x6x128xf32>
    %31 = vector.broadcast %29 : vector<1x6x1xf32> to vector<2x6x128xf32>
    %32 = arith.mulf %30, %31 : vector<2x6x128xf32>
    %33 = arith.addf %25, %32 : vector<2x6x128xf32>
    %34 = vector.extract_strided_slice %9 {offsets = [0, 3], sizes = [2, 128], strides = [1, 1]} : vector<2x134xf32> to vector<2x128xf32>
    %35 = vector.extract_strided_slice %10 {offsets = [0, 3], sizes = [6, 1], strides = [1, 1]} : vector<6x7xf32> to vector<6x1xf32>
    %36 = vector.shape_cast %34 : vector<2x128xf32> to vector<2x1x128xf32>
    %37 = vector.shape_cast %35 : vector<6x1xf32> to vector<1x6x1xf32>
    %38 = vector.broadcast %36 : vector<2x1x128xf32> to vector<2x6x128xf32>
    %39 = vector.broadcast %37 : vector<1x6x1xf32> to vector<2x6x128xf32>
    %40 = arith.mulf %38, %39 : vector<2x6x128xf32>
    %41 = arith.addf %33, %40 : vector<2x6x128xf32>
    %42 = vector.extract_strided_slice %9 {offsets = [0, 4], sizes = [2, 128], strides = [1, 1]} : vector<2x134xf32> to vector<2x128xf32>
    %43 = vector.extract_strided_slice %10 {offsets = [0, 4], sizes = [6, 1], strides = [1, 1]} : vector<6x7xf32> to vector<6x1xf32>
    %44 = vector.shape_cast %42 : vector<2x128xf32> to vector<2x1x128xf32>
    %45 = vector.shape_cast %43 : vector<6x1xf32> to vector<1x6x1xf32>
    %46 = vector.broadcast %44 : vector<2x1x128xf32> to vector<2x6x128xf32>
    %47 = vector.broadcast %45 : vector<1x6x1xf32> to vector<2x6x128xf32>
    %48 = arith.mulf %46, %47 : vector<2x6x128xf32>
    %49 = arith.addf %41, %48 : vector<2x6x128xf32>
    %50 = vector.extract_strided_slice %9 {offsets = [0, 5], sizes = [2, 128], strides = [1, 1]} : vector<2x134xf32> to vector<2x128xf32>
    %51 = vector.extract_strided_slice %10 {offsets = [0, 5], sizes = [6, 1], strides = [1, 1]} : vector<6x7xf32> to vector<6x1xf32>
    %52 = vector.shape_cast %50 : vector<2x128xf32> to vector<2x1x128xf32>
    %53 = vector.shape_cast %51 : vector<6x1xf32> to vector<1x6x1xf32>
    %54 = vector.broadcast %52 : vector<2x1x128xf32> to vector<2x6x128xf32>
    %55 = vector.broadcast %53 : vector<1x6x1xf32> to vector<2x6x128xf32>
    %56 = arith.mulf %54, %55 : vector<2x6x128xf32>
    %57 = arith.addf %49, %56 : vector<2x6x128xf32>
    %58 = vector.extract_strided_slice %9 {offsets = [0, 6], sizes = [2, 128], strides = [1, 1]} : vector<2x134xf32> to vector<2x128xf32>
    %59 = vector.extract_strided_slice %10 {offsets = [0, 6], sizes = [6, 1], strides = [1, 1]} : vector<6x7xf32> to vector<6x1xf32>
    %60 = vector.shape_cast %58 : vector<2x128xf32> to vector<2x1x128xf32>
    %61 = vector.shape_cast %59 : vector<6x1xf32> to vector<1x6x1xf32>
    %62 = vector.broadcast %60 : vector<2x1x128xf32> to vector<2x6x128xf32>
    %63 = vector.broadcast %61 : vector<1x6x1xf32> to vector<2x6x128xf32>
    %64 = arith.mulf %62, %63 : vector<2x6x128xf32>
    %65 = arith.addf %57, %64 : vector<2x6x128xf32>
    %c0_6 = arith.constant 0 : index
    %c0_7 = arith.constant 0 : index
    %c0_8 = arith.constant 0 : index
    %66 = vector.load %arg3[%c0_6, %c0_7, %c0_8] : memref<2x6x128xf32, #tpu.memory_space<vmem>>, vector<2x6x128xf32>
    tpu.vector_store %arg3[%c0_6, %c0_7, %c0_8], %65 {strides = array<i32>} : memref<2x6x128xf32, #tpu.memory_space<vmem>>, vector<2x6x128xf32>,
    return
  }
  func.func @transform_0(%arg0: i32) -> (i32, i32) {
    %c0_i32 = arith.constant 0 : i32
    %c0_i32_0 = arith.constant 0 : i32
    return %arg0, %c0_i32 : i32, i32
  }
  func.func @transform_1(%arg0: i32) -> (i32, i32) {
    %c0_i32 = arith.constant 0 : i32
    %c0_i32_0 = arith.constant 0 : i32
    %c0_i32_1 = arith.constant 0 : i32
    return %c0_i32, %c0_i32_0 : i32, i32
  }
  func.func @transform_2(%arg0: i32) -> (i32, i32, i32) {
    %c0_i32 = arith.constant 0 : i32
    %c0_i32_0 = arith.constant 0 : i32
    %c0_i32_1 = arith.constant 0 : i32
    return %arg0, %c0_i32, %c0_i32_0 : i32, i32, i32
  }
}

</mosaic_0001>

<bundles_post_ra>
// kernel: tpu_custom_call.1
= control target key start
LH: loop header
LB: loop body
LE: loop exit
PB: predicated region body
PF: predicated region fallthrough
CT: control target
= control target key end

     0   :  { %7 = vsyncpa [#allocation3], 0  ;;  %s427_s0 = inlined_call_operand.hbm [shape: f32[2,128], index: 0, kind: input, shape index: {}]   ;;  %s428_s1 = inlined_call_operand.hbm [shape: f32[6,7], index: 1, kind: input, shape index: {}]   ;;  %s429_s2 = inlined_call_operand.vmem [shape: f32[2,6,128], index: 2, kind: output, shape index: {}]  }
   0x1   :  { %s14_s11 = sshll.u32 %s427_s0, 4  ;;  %s15_s11 = int_to_ptr.hbm [resolvable:$true] %s14_s11 }
   0x2   :  { %8 = vsyncpa [#allocation5], 0  ;;  %s344_s12 = smov [#allocation2]   ;;  %s25_s16 = sshll.u32 %s428_s1, 4  ;;  %s26_s16 = int_to_ptr.hbm [resolvable:$true] %s25_s16 }
   0x3   :  { %s16_s13 = sshll.u32 %s344_s12, 4  ;;  %s345_s17 = smov [#allocation4]   ;;  %s17_s13 = int_to_ptr.vmem [resolvable:$true] %s16_s13 }
   0x4   :  { %19 = dma.hbm_to_vmem [thread:$0]  %s15_s11, 32, %s17_s13, [#allocation3]  }
   0x5   :  { %s27_s18 = sshll.u32 %s345_s17, 4  ;;  %s28_s18 = int_to_ptr.vmem [resolvable:$true] %s27_s18 }
   0x6   :  { %30 = dma.hbm_to_vmem [thread:$0]  %s26_s16, 128, %s28_s18, [#allocation5]  }
   0x7   :  { %340 = dma.done.wait [#allocation3], 32  }
   0x8   :  { %341 = vsyncadd [#allocation3], 4294967264 }
   0x9   :  { %342 = dma.done.wait [#allocation5], 128  }
   0xa   :  { %343 = vsyncadd [#allocation5], 4294967168  ;;  %v346_v0 = vmov 0   ;;  %vm40_vm0 = vcmask 1041408   ;;  %v39_v1 = vld [vmem:[#allocation2] sm:$0x3] }
   0xb   :  { %282 = vset.pattern.permute.xlu1 %v346_v0  ;;  %v41_v2 = vsel %vm40_vm0, %v39_v1, -inf  ;;  %v67_v3 = vld [vmem:[#allocation4] sm:$0x3f]  ;;  %v347_v4 = vmov 1   ;;  %v348_v5 = vmov 2   ;;  %v349_v6 = vmov 4  }
   0xc   :  { %42 = vmax.xlane.f32.xlu0 %v41_v2  ;;  %76 = vperm.xlu1 %282, %v67_v3   ;;  %v350_v7 = vmov 5   ;;  %v351_v8 = vmov 3   ;;  %v352_v11 = vmov 6   ;;  %s353_s0 = smov 3   ;;  %vm64_vm5 = vcmask 23552   ;;  %s354_s1 = smov 125  }
   0xd   :  { %286 = vset.pattern.permute.xlu0 %v349_v6  ;;  %285 = vset.pattern.permute.xlu2 %v351_v8  ;;  %vm83_vm6 = vcmask 1040384   ;;  %vm85_vm7 = vcmask 1041409   ;;  %s355_s19 = smov 126   ;;  %s356_s20 = smov 127   ;;  %vm116_vm8 = vcmask 1039360   ;;  %vm143_vm9 = vcmask 1031168  }
   0xe   :  { %151 = vperm.xlu2 %285, %v67_v3   ;;  %s357_s21 = smov 124   ;;  %s358_s22 = smov 123   ;;  %vm170_vm10 = vcmask 1022976   ;;  %vm197_vm11 = vcmask 1014784   ;;  %vm224_vm12 = vcmask 1006592   ;;  %vm251_vm13 = vcmask 998400  }
   0xf   :  { %s359_s23 = smov 122  }
  0x14   :  { %283 = vset.pattern.permute.xlu1 %v347_v4 }
  0x15   :  { %97 = vperm.xlu1 %283, %v67_v3  }
  0x16   :  { %288 = vset.pattern.permute.xlu2 %v352_v11 }
  0x17   :  { %232 = vperm.xlu2 %288, %v67_v3  }
  0x1d   :  { %284 = vset.pattern.permute.xlu1 %v348_v5 }
  0x1e   :  { %124 = vperm.xlu1 %284, %v67_v3  }
  0x26   :  { %287 = vset.pattern.permute.xlu1 %v350_v7 }
  0x27   :  { %205 = vperm.xlu1 %287, %v67_v3  }
  0x68   :  { %v152_v36 = vpop.permute.xlu2 %151 }
  0x71   :  { %v233_v60 = vpop.permute.xlu2 %232 }
  0x7e   :  { %v77_v23 = vpop.permute.xlu1 %76 }
  0x7f   :  { %v43_v9 = vpop.xlane.xlu0 %42 }
  0x80   :  { %v44_v10 = vmax.f32 %v43_v9, 1.1920929e-07 }
  0x82   :  { %290 = vrcp.f32 %v44_v10  ;;  %v56_v15 = vand.u32 2147483648, %v44_v10  ;;  %v54_v17 = vand.u32 2147483647, %v44_v10  ;;  %vm50_vm2 = vweird.f32 %v44_v10 }
  0x84   :  { %v57_v19 = vor.u32 1.1754944e-38, %v56_v15  ;;  %vm55_vm4 = vcmp.eq.f32.partialorder %v54_v17, 8.507059e+37 }
  0x87   :  { %v381_v24 = vpop.permute.xlu1 %97 }
  0x88   :  { %v291_v12 = vpop.eup %290 }
  0x89   :  { %v46_v13 = vmul.f32 %v291_v12, %v44_v10  ;;  %vm51_vm1 = vweird.f32 %v291_v12 }
  0x8a   :  { %vm52_vm3 = vmor %vm50_vm2, %vm51_vm1 }
  0x8b   :  { %v47_v14 = vsub.f32 1.0, %v46_v13 }
  0x8d   :  { %v48_v16 = vmul.f32 %v291_v12, %v47_v14 }
  0x8f   :  { %v49_v18 = vadd.f32 %v291_v12, %v48_v16 }
  0x90   :  { %v125_v37 = vpop.permute.xlu1 %124 }
  0x91   :  { %v53_v20 = vsel %vm52_vm3, %v291_v12, %v49_v18 }
  0x92   :  { %v58_v21 = vsel %vm55_vm4, %v57_v19, %v53_v20 }
  0x93   :  { %v59_v22 = vmul.f32 %v58_v21, %v39_v1 }
  0x95   :  { %61 = vrot.lane.b32.xlu0 %v59_v22, %s353_s0 }
  0x99   :  { %v206_v49 = vpop.permute.xlu1 %205 }
  0x9d   :  { %178 = vperm.xlu0 %286, %v67_v3  }
  0xa5   :  { %289 = vset.pattern.permute.xlu0 %v352_v11 }
 0x107   :  { %v62_v25 = vpop.permute.xlu0 %61 }
 0x108   :  { %v65_v26 = vsel %vm64_vm5, 0.0, %v62_v25  ;;  %v66_v27 = vsel %vm64_vm5, %v62_v25, 0.0 }
 0x109   :  { %v69_v28 = vrot.slane %v65_v26, 1  ;;  %v70_v29 = vperm.slane %v65_v26, 0  ;;  %v82_v30 = vrot.slane %v66_v27, 7 }
 0x10b   :  { %v71_v31 = vperm.slane %v69_v28, 0  ;;  %v84_v32 = vsel %vm83_vm6, %v65_v26, %v82_v30  ;;  %v383_v33 = vmul.f32 %v77_v23, %v70_v29  ;;  %v86_v42 = vsel %vm85_vm7, %v65_v26, %v82_v30 }
 0x10c   :  { %v88_v34 = vperm.slane %v84_v32, 0  ;;  %v89_v35 = vperm.slane %v84_v32, 1  ;;  %v87_v44 = vrot.slane %v86_v42, 1 }
 0x10d   :  { %v385_v38 = vmul.f32 %v77_v23, %v71_v31 }
 0x10e   :  { %v155_v39 = vmul.f32 %v152_v36, %v89_v35  ;;  %v127_v40 = vmul.f32 %v125_v37, %v88_v34  ;;  %v100_v41 = vmul.f32 %v381_v24, %v88_v34  ;;  %v101_v47 = vmul.f32 %v381_v24, %v89_v35 }
 0x10f   :  { %v179_v43 = vpop.permute.xlu0 %178  ;;  %v90_v48 = vperm.slane %v87_v44, 0  ;;  %v208_v50 = vmul.f32 %v206_v49, %v88_v34  ;;  %v128_v52 = vmul.f32 %v125_v37, %v89_v35  ;;  %v91_v53 = vperm.slane %v87_v44, 1 }
 0x110   :  { %164 = vrot.lane.b32.xlu0 %v155_v39, %s354_s1  ;;  %135 = vrot.lane.b32.xlu1 %v127_v40, %s355_s19  ;;  %v182_v45 = vmul.f32 %v179_v43, %v89_v35  ;;  %v181_v46 = vmul.f32 %v179_v43, %v88_v34  ;;  %v154_v56 = vmul.f32 %v152_v36, %v88_v34 }
 0x111   :  { %108 = vrot.lane.b32.xlu2 %v100_v41, %s356_s20  ;;  %v129_v51 = vmul.f32 %v125_v37, %v90_v48  ;;  %v102_v54 = vmul.f32 %v381_v24, %v90_v48  ;;  %v184_v55 = vmul.f32 %v179_v43, %v91_v53  ;;  %v130_v57 = vmul.f32 %v125_v37, %v91_v53 }
 0x112   :  { %v210_v58 = vmul.f32 %v206_v49, %v90_v48  ;;  %v209_v59 = vmul.f32 %v206_v49, %v89_v35  ;;  %v156_v61 = vmul.f32 %v152_v36, %v90_v48  ;;  %v236_v62 = vmul.f32 %v233_v60, %v89_v35 }
 0x113   :  { %v235_v63 = vmul.f32 %v233_v60, %v88_v34  ;;  %v211_v0 = vmul.f32 %v206_v49, %v91_v53  ;;  %v103_v1 = vmul.f32 %v381_v24, %v91_v53  ;;  %v237_v2 = vmul.f32 %v233_v60, %v90_v48 }
 0x114   :  { %v157_v3 = vmul.f32 %v152_v36, %v91_v53  ;;  %v183_v4 = vmul.f32 %v179_v43, %v90_v48  ;;  %v238_v5 = vmul.f32 %v233_v60, %v91_v53 }
 0x118   :  { %191 = vrot.lane.b32.xlu1 %v182_v45, %s357_s21  ;;  %189 = vrot.lane.b32.xlu0 %v181_v46, %s357_s21 }
 0x119   :  { %110 = vrot.lane.b32.xlu2 %v101_v47, %s356_s20 }
 0x120   :  { %216 = vrot.lane.b32.xlu1 %v208_v50, %s358_s22  ;;  %139 = vrot.lane.b32.xlu0 %v129_v51, %s355_s19 }
 0x121   :  { %137 = vrot.lane.b32.xlu2 %v128_v52, %s355_s19 }
 0x128   :  { %112 = vrot.lane.b32.xlu1 %v102_v54, %s356_s20  ;;  %195 = vrot.lane.b32.xlu0 %v184_v55, %s357_s21 }
 0x129   :  { %162 = vrot.lane.b32.xlu2 %v154_v56, %s354_s1 }
 0x130   :  { %141 = vrot.lane.b32.xlu1 %v130_v57, %s355_s19  ;;  %220 = vrot.lane.b32.xlu0 %v210_v58, %s358_s22 }
 0x131   :  { %218 = vrot.lane.b32.xlu2 %v209_v59, %s358_s22 }
 0x138   :  { %166 = vrot.lane.b32.xlu1 %v156_v61, %s354_s1  ;;  %245 = vrot.lane.b32.xlu0 %v236_v62, %s359_s23 }
 0x139   :  { %243 = vrot.lane.b32.xlu2 %v235_v63, %s359_s23 }
 0x140   :  { %222 = vrot.lane.b32.xlu1 %v211_v0, %s358_s22 }
 0x141   :  { %114 = vrot.lane.b32.xlu2 %v103_v1, %s356_s20 }
 0x148   :  { %247 = vrot.lane.b32.xlu1 %v237_v2, %s359_s23 }
 0x149   :  { %168 = vrot.lane.b32.xlu2 %v157_v3, %s354_s1 }
 0x151   :  { %193 = vrot.lane.b32.xlu2 %v183_v4, %s357_s21 }
 0x159   :  { %249 = vrot.lane.b32.xlu2 %v238_v5, %s359_s23 }
 0x16b   :  { %v109_v6 = vpop.permute.xlu2 %108 }
 0x173   :  { %v111_v7 = vpop.permute.xlu2 %110 }
 0x174   :  { %v117_v21 = vsel %vm116_vm8, %v109_v6, %v111_v7 }
 0x175   :  { %v121_v23 = vadd.f32 %v117_v21, %v383_v33 }
 0x17b   :  { %v138_v8 = vpop.permute.xlu2 %137 }
 0x182   :  { %v136_v9 = vpop.permute.xlu1 %135  ;;  %v165_v10 = vpop.permute.xlu0 %164 }
 0x183   :  { %v163_v11 = vpop.permute.xlu2 %162  ;;  %v144_v22 = vsel %vm143_vm9, %v136_v9, %v138_v8 }
 0x184   :  { %v148_v24 = vadd.f32 %v144_v22, %v121_v23  ;;  %v171_v27 = vsel %vm170_vm10, %v163_v11, %v165_v10 }
 0x186   :  { %v175_v29 = vadd.f32 %v171_v27, %v148_v24 }
 0x18a   :  { %v192_v12 = vpop.permute.xlu1 %191  ;;  %v190_v13 = vpop.permute.xlu0 %189 }
 0x18b   :  { %v219_v14 = vpop.permute.xlu2 %218  ;;  %v198_v28 = vsel %vm197_vm11, %v190_v13, %v192_v12 }
 0x18c   :  { %v202_v32 = vadd.f32 %v198_v28, %v175_v29 }
 0x192   :  { %v217_v15 = vpop.permute.xlu1 %216  ;;  %v140_v16 = vpop.permute.xlu0 %139 }
 0x193   :  { %v244_v17 = vpop.permute.xlu2 %243  ;;  %v225_v31 = vsel %vm224_vm12, %v217_v15, %v219_v14 }
 0x194   :  { %v229_v34 = vadd.f32 %v225_v31, %v202_v32 }
 0x19a   :  { %v113_v18 = vpop.permute.xlu1 %112  ;;  %v196_v19 = vpop.permute.xlu0 %195 }
 0x19b   :  { %v115_v20 = vpop.permute.xlu2 %114 }
 0x19c   :  { %v118_v39 = vsel %vm116_vm8, %v113_v18, %v115_v20 }
 0x19d   :  { %v122_v41 = vadd.f32 %v118_v39, %v385_v38 }
 0x1a2   :  { %v142_v25 = vpop.permute.xlu1 %141  ;;  %v221_v26 = vpop.permute.xlu0 %220 }
 0x1a3   :  { %v169_v30 = vpop.permute.xlu2 %168  ;;  %v145_v40 = vsel %vm143_vm9, %v140_v16, %v142_v25 }
 0x1a4   :  { %v149_v44 = vadd.f32 %v145_v40, %v122_v41 }
 0x1aa   :  { %v167_v35 = vpop.permute.xlu1 %166  ;;  %v246_v36 = vpop.permute.xlu0 %245 }
 0x1ab   :  { %v252_v33 = vsel %vm251_vm13, %v244_v17, %v246_v36  ;;  %v194_v42 = vpop.permute.xlu2 %193  ;;  %v172_v43 = vsel %vm170_vm10, %v167_v35, %v169_v30 }
 0x1ac   :  { %v256_v37 = vadd.f32 %v252_v33, %v229_v34  ;;  %v176_v46 = vadd.f32 %v172_v43, %v149_v44  ;;  %v199_v47 = vsel %vm197_vm11, %v194_v42, %v196_v19 }
 0x1ae   :  { %258 = vst [vmem:[%s429_s2] sm:$0x3f] %v256_v37  ;;  %v203_v49 = vadd.f32 %v199_v47, %v176_v46 }
 0x1b2   :  { %v223_v45 = vpop.permute.xlu1 %222 }
 0x1b3   :  { %v226_v48 = vsel %vm224_vm12, %v221_v26, %v223_v45  ;;  %v250_v50 = vpop.permute.xlu2 %249 }
 0x1b4   :  { %v230_v51 = vadd.f32 %v226_v48, %v203_v49 }
 0x1ba   :  { %v248_v52 = vpop.permute.xlu1 %247 }
 0x1bb   :  { %v253_v53 = vsel %vm251_vm13, %v248_v52, %v250_v50 }
 0x1bc   :  { %v257_v54 = vadd.f32 %v253_v53, %v230_v51 }
 0x1be   :  { %259 = vst [vmem:[%s429_s2 + $0x8] sm:$0x3f] %v257_v54 }
 0x1bf   :  { %264 = vsyncpa [#allocation3], 1 }
 0x1c0   :  { %265 = vsyncpa [#allocation5], 1 }

</bundles_post_ra>
